<compile_context>
chip_gen: v7x
topology: tpu7x:2x2x1
jax: 0.10.0
libtpu: 0.0.40
codegen_flags: <defaults>
</compile_context>

<pallas_src>
import jax
import jax.numpy as jnp
import numpy as np
from jax.experimental import pallas as pl
from jax.experimental.pallas import tpu as pltpu


DEFAULT_MM_DTYPE = jnp.bfloat16   # MXU feed dtype; math/accumulation stay f32


def core_diffusion_kernel(adj_ref, x_ref, w_ih_t_ref, w_hh_r_ref, w_hh_z_ref,
                          w_hh_n_ref, bias_gi_ref, b_hh_n_ref, gamma_ref,
                          beta_ref, out_ref):
    """One (batch-block, node-tile) grid step.

    adj_ref : (C, Bt, TN, N)  core-leading adjacency block (mm dtype)
    x_ref   : (Bt, N, D)      source-node embeddings       (mm dtype)
    out_ref : (Bt, TN, H)     LayerNorm(sum_c GRU outputs) (f32)
    """
    C, Bt, TN, N = adj_ref.shape
    D = x_ref.shape[-1]
    H = out_ref.shape[-1]
    H3 = 3 * H
    R = Bt * TN                                  # GRU rows in this grid step
    mm_dtype = w_ih_t_ref.dtype                  # bf16 by default, f32 optional

    # ---- 1) graph diffusion: all cores in ONE batched MXU call -------------
    # Core axis is leading (host-side transpose), so the reshapes below are
    # leading-dim merges (layout-free for TN % 8 == 0) and the recurrence can
    # index gi_*[c] with zero data movement.
    adj = adj_ref[...].reshape(C * Bt, TN, N)
    x_rep = jnp.tile(x_ref[...], (C, 1, 1))                   # (C*Bt, N, D)
    hx = jnp.einsum("kin,knd->kid", adj, x_rep,
                    preferred_element_type=jnp.float32)       # (C*Bt, TN, D) f32

    # ---- 2) input projection for all (c, b, node) rows, hoisted ------------
    gi = jnp.dot(hx.reshape(C * R, D).astype(mm_dtype), w_ih_t_ref[...],
                 preferred_element_type=jnp.float32)          # (C*R, 3H) f32
    gi = gi + bias_gi_ref[...]        # r/z thirds already carry b_hh_r, b_hh_z
    gi = gi.reshape(C, R, H3)         # core-leading: gi_*[c] is a free index
    # One-time per-gate lane split (paid once, off the serial C tail).
    gi_r = gi[..., 0:H]
    gi_z = gi[..., H:2 * H]
    gi_n = gi[..., 2 * H:H3]

    # Hoist the b_hh_n broadcast out of the recurrence (JAX does not CSE
    # broadcast_in_dim); only the n-gate's b_hh survives in-loop because of
    # the r * (.) multiply.
    b_hh_n = jnp.broadcast_to(b_hh_n_ref[...], (R, H))
    w_hh_r = w_hh_r_ref[...]
    w_hh_z = w_hh_z_ref[...]
    w_hh_n = w_hh_n_ref[...]

    # ---- 3) serial GRU recurrence over the core axis ------------------------
    # Per-gate (H, H) recurrent weights -> no in-loop lane slicing of a
    # 3H-wide result.  PyTorch gate order: r, z, n.
    def gru_step(c, h, acc):
        hq = h.astype(mm_dtype)
        gh_r = jnp.dot(hq, w_hh_r, preferred_element_type=jnp.float32)
        gh_z = jnp.dot(hq, w_hh_z, preferred_element_type=jnp.float32)
        gh_n = jnp.dot(hq, w_hh_n, preferred_element_type=jnp.float32) + b_hh_n
        r = jax.nn.sigmoid(gi_r[c] + gh_r)
        z = jax.nn.sigmoid(gi_z[c] + gh_z)
        n = jnp.tanh(gi_n[c] + r * gh_n)
        h_new = (1.0 - z) * n + z * h
        return h_new, acc + h_new                # sum of GRU outputs over time

    h = jnp.zeros((R, H), jnp.float32)
    acc = jnp.zeros((R, H), jnp.float32)
    if C <= 8:                        # small C: static unroll (LLO visibility)
        for c in range(C):
            h, acc = gru_step(c, h, acc)
    else:                             # long core chains: bound vreg live ranges
        h, acc = jax.lax.fori_loop(
            0, C, lambda c, carry: gru_step(c, *carry), (h, acc))

    # ---- 4) LayerNorm over the feature dim (eps = nn.LayerNorm default) ----
    mean = jnp.mean(acc, axis=-1, keepdims=True)
    var = jnp.mean((acc - mean) ** 2, axis=-1, keepdims=True)
    normed = (acc - mean) * jax.lax.rsqrt(var + 1e-5)
    out = normed * gamma_ref[...] + beta_ref[...]
    # TODO(synk): H=32 (<128 lanes) keeps this store masked; a lane-dense
    # output repack is only worth doing if a profile shows vst/VALU binding.
    out_ref[...] = out.reshape(Bt, TN, H).astype(out_ref.dtype)


def _padded_bytes(shape, itemsize):
    """VMEM footprint of a 2-D-tiled buffer (lane pad 128, sublane pad 8/16/32)."""
    shape = (1,) * (2 - len(shape)) + tuple(shape)
    lead = 1
    for s in shape[:-2]:
        lead *= s
    sub_tile = 8 * max(1, 4 // max(1, itemsize))
    sub = -(-shape[-2] // sub_tile) * sub_tile
    lane = -(-shape[-1] // 128) * 128
    return lead * sub * lane * itemsize


def _pick_tiles(B, C, N, adj_itemsize, batch_block, node_block):
    """Default tiles: bt=1, node tile a multiple-of-8 divisor of N, sized so the
    (double-buffered) adj block stays ~2 MiB and the grid has >=4 steps."""
    bt = 1 if batch_block is None else batch_block
    assert B % bt == 0, "batch_block must divide B"
    if node_block is not None:
        assert N % node_block == 0, "node_block must divide N"
        return bt, node_block
    cands = [t for t in range(8, N + 1, 8) if N % t == 0] or [N]
    budget = 2 << 20
    tn = cands[0]
    for t in cands:                           # largest tile within the budget
        if bt * C * t * max(N, 128) * adj_itemsize <= budget:
            tn = t
    if (B // bt) * (N // tn) < 4:             # prefer >=4 steps (pipelining,
        for t in reversed(cands):             #  and work for both v7x TCs)
            if (B // bt) * (N // t) >= 4:
                tn = t
                break
    return bt, tn


def _vmem_limit_bytes(bt, tn, C, N, D, H, mm_dtype):
    it = jnp.dtype(mm_dtype).itemsize
    H3 = 3 * H
    blocks = (2 * _padded_bytes((C * bt * tn, N), it)      # adj (double-buffered)
              + 2 * _padded_bytes((bt * N, D), it)         # x
              + 2 * _padded_bytes((bt * tn, H), 4)         # out
              + 2 * (_padded_bytes((D, H3), it) + 3 * _padded_bytes((H, H), it)
                     + _padded_bytes((1, H3), 4) + 3 * _padded_bytes((1, H), 4)))
    body = (_padded_bytes((C * bt * N, D), it)             # x tiled over cores
            + _padded_bytes((C * bt * tn, D), 4)           # hx (f32)
            + 2 * _padded_bytes((C * bt * tn, H3), 4)      # gi + per-gate split
            + 10 * _padded_bytes((bt * tn, H), 4))         # GRU / LayerNorm temps
    est = blocks + body
    return int(min(max(2 * est, 32 * (1 << 20)), 48 * (1 << 20)))


def core_diffusion_batch(x, adj_list, params, *, batch_block=None,
                         node_block=None, matmul_dtype=DEFAULT_MM_DTYPE):
    """Pallas forward of CoreDiffusionBatch (rnn_type='GRU')."""
    B, N, D = x.shape
    _, C, _, _ = adj_list.shape
    H = params["gamma"].shape[-1]
    H3 = 3 * H
    mm_dtype = jnp.float32 if matmul_dtype is None else matmul_dtype
    mm_itemsize = jnp.dtype(mm_dtype).itemsize

    bt, tn = _pick_tiles(B, C, N, mm_itemsize, batch_block, node_block)

    # ---- host-side layout prep (one-off, outside the kernel) ----------------
    # Core axis leading; transpose fuses with the bf16 cast into a single pass.
    adj_t = jnp.transpose(adj_list, (1, 0, 2, 3)).astype(mm_dtype)   # (C,B,N,N)
    x_q = x.astype(mm_dtype)
    w_ih_t = jnp.asarray(params["w_ih"]).T.astype(mm_dtype)          # (D, 3H)
    w_hh = jnp.asarray(params["w_hh"])
    w_hh_r_t = w_hh[0:H].T.astype(mm_dtype)          # per-gate (H, H): removes
    w_hh_z_t = w_hh[H:2 * H].T.astype(mm_dtype)      # in-loop lane slicing
    w_hh_n_t = w_hh[2 * H:].T.astype(mm_dtype)
    b_ih = jnp.asarray(params["b_ih"], jnp.float32)
    b_hh = jnp.asarray(params["b_hh"], jnp.float32)
    # Fold b_hh_r / b_hh_z into the hoisted input-projection bias; only the
    # n-gate's b_hh must stay inside the recurrence (multiplied by r).
    bias_gi = jnp.concatenate(
        [b_ih[:H] + b_hh[:H], b_ih[H:2 * H] + b_hh[H:2 * H], b_ih[2 * H:]]
    ).reshape(1, H3)
    b_hh_n = b_hh[2 * H:].reshape(1, H)
    gamma = jnp.asarray(params["gamma"], jnp.float32).reshape(1, H)
    beta = jnp.asarray(params["beta"], jnp.float32).reshape(1, H)
    # TODO(synk): self.linear from __init__ is unused in
    # CoreDiffusionBatch.forward, so it is omitted here.

    flops = 2 * B * C * N * (N * D + D * H3 + H * H3)
    transcendentals = 3 * B * C * N * H + B * N
    bytes_accessed = (B * C * N * N * mm_itemsize + B * N * D * mm_itemsize
                      + B * N * H * 4
                      + (D * H3 + 3 * H * H) * mm_itemsize + 8 * H3)

    grid = (B // bt, N // tn)
    return pl.pallas_call(
        core_diffusion_kernel,
        out_shape=jax.ShapeDtypeStruct((B, N, H), jnp.float32),
        grid_spec=pltpu.PrefetchScalarGridSpec(
            num_scalar_prefetch=0,
            grid=grid,
            in_specs=[
                pl.BlockSpec((C, bt, tn, N), lambda i, j: (0, i, j, 0)),  # adj
                pl.BlockSpec((bt, N, D), lambda i, j: (i, 0, 0)),         # x
                pl.BlockSpec((D, H3), lambda i, j: (0, 0)),               # W_ih^T
                pl.BlockSpec((H, H), lambda i, j: (0, 0)),                # W_hr^T
                pl.BlockSpec((H, H), lambda i, j: (0, 0)),                # W_hz^T
                pl.BlockSpec((H, H), lambda i, j: (0, 0)),                # W_hn^T
                pl.BlockSpec((1, H3), lambda i, j: (0, 0)),               # bias_gi
                pl.BlockSpec((1, H), lambda i, j: (0, 0)),                # b_hh_n
                pl.BlockSpec((1, H), lambda i, j: (0, 0)),                # gamma
                pl.BlockSpec((1, H), lambda i, j: (0, 0)),                # beta
            ],
            out_specs=pl.BlockSpec((bt, tn, H), lambda i, j: (i, j, 0)),
        ),
        compiler_params=pltpu.CompilerParams(
            dimension_semantics=("parallel", "parallel"),
            vmem_limit_bytes=_vmem_limit_bytes(bt, tn, C, N, D, H, mm_dtype)),
        cost_estimate=pl.CostEstimate(flops=int(flops),
                                      transcendentals=int(transcendentals),
                                      bytes_accessed=int(bytes_accessed)),
    )(adj_t, x_q, w_ih_t, w_hh_r_t, w_hh_z_t, w_hh_n_t,
      bias_gi, b_hh_n, gamma, beta)


def reference_forward(x, adj_list, params, matmul_dtype=None):
    """Pure-JAX reference mirroring the PyTorch forward (and the kernel's
    matmul-operand casts, so the comparison isolates kernel bugs)."""
    B, N, D = x.shape
    C = adj_list.shape[1]
    H = params["gamma"].shape[-1]
    md = jnp.float32 if matmul_dtype is None else matmul_dtype
    w_ih = jnp.asarray(params["w_ih"]).astype(md)
    w_hh = jnp.asarray(params["w_hh"]).astype(md)
    b_ih = jnp.asarray(params["b_ih"], jnp.float32)
    b_hh = jnp.asarray(params["b_hh"], jnp.float32)

    hx = jnp.einsum("bcij,bjd->bcid", adj_list.astype(md), x.astype(md),
                    preferred_element_type=jnp.float32)          # (B,C,N,D)
    seq = jnp.transpose(hx, (0, 2, 1, 3)).reshape(B * N, C, D)   # (B*N,C,D)

    def step(h, x_t):
        gi = jnp.dot(x_t.astype(md), w_ih.T,
                     preferred_element_type=jnp.float32) + b_ih
        gh = jnp.dot(h.astype(md), w_hh.T,
                     preferred_element_type=jnp.float32) + b_hh
        r = jax.nn.sigmoid(gi[:, :H] + gh[:, :H])
        z = jax.nn.sigmoid(gi[:, H:2 * H] + gh[:, H:2 * H])
        n = jnp.tanh(gi[:, 2 * H:] + r * gh[:, 2 * H:])
        h_new = (1.0 - z) * n + z * h
        return h_new, h_new

    h0 = jnp.zeros((B * N, H), jnp.float32)
    _, outs = jax.lax.scan(step, h0, jnp.transpose(seq, (1, 0, 2)))
    out_sum = outs.sum(axis=0)                                   # (B*N, H)
    mean = out_sum.mean(-1, keepdims=True)
    var = ((out_sum - mean) ** 2).mean(-1, keepdims=True)
    normed = (out_sum - mean) / jnp.sqrt(var + 1e-5)
    normed = normed * params["gamma"] + params["beta"]
    return normed.reshape(B, N, H)


if __name__ == "__main__":
    # Small shapes consistent with the module's forward.
    B, C, N = 2, 3, 16          # batch, max_core, n_nodes
    D, H = 32, 32               # input_dim (embed), output_dim (GRU hidden)

    key = jax.random.PRNGKey(0)
    kx, ka, k1, k2, k3, k4 = jax.random.split(key, 6)

    x = jax.random.normal(kx, (B, N, D), dtype=jnp.float32)
    adj_list = jax.random.uniform(ka, (B, C, N, N), dtype=jnp.float32)

    # Deterministic parameter init (PyTorch-style uniform(-1/sqrt(H), 1/sqrt(H))).
    bound = 1.0 / np.sqrt(H)
    params = {
        "w_ih": jax.random.uniform(k1, (3 * H, D), jnp.float32, -bound, bound),
        "w_hh": jax.random.uniform(k2, (3 * H, H), jnp.float32, -bound, bound),
        "b_ih": jax.random.uniform(k3, (3 * H,), jnp.float32, -bound, bound),
        "b_hh": jax.random.uniform(k4, (3 * H,), jnp.float32, -bound, bound),
        "gamma": jnp.ones((H,), jnp.float32),
        "beta": jnp.zeros((H,), jnp.float32),
    }

    out = jax.block_until_ready(core_diffusion_batch(x, adj_list, params))
    # Compare against a reference that applies the same bf16 operand casts
    # (f32 accumulation in both), so tolerances only cover reduction-order /
    # transcendental-approximation differences.
    ref = jax.block_until_ready(
        reference_forward(x, adj_list, params, matmul_dtype=DEFAULT_MM_DTYPE))
    np.testing.assert_allclose(np.asarray(out), np.asarray(ref),
                               rtol=5e-3, atol=5e-3)
    print("KERNEL_OK")
</pallas_src>

<mosaic_0001>
module attributes {stable_mosaic.version = 11 : i64} {
  func.func @core_diffusion_kernel(%arg0: i32, %arg1: i32, %arg2: memref<3x1x8x16xbf16, #tpu.memory_space<vmem>>, %arg3: memref<1x16x32xbf16, #tpu.memory_space<vmem>>, %arg4: memref<32x96xbf16, #tpu.memory_space<vmem>>, %arg5: memref<32x32xbf16, #tpu.memory_space<vmem>>, %arg6: memref<32x32xbf16, #tpu.memory_space<vmem>>, %arg7: memref<32x32xbf16, #tpu.memory_space<vmem>>, %arg8: memref<1x96xf32, #tpu.memory_space<vmem>>, %arg9: memref<1x32xf32, #tpu.memory_space<vmem>>, %arg10: memref<1x32xf32, #tpu.memory_space<vmem>>, %arg11: memref<1x32xf32, #tpu.memory_space<vmem>>, %arg12: memref<1x8x32xf32, #tpu.memory_space<vmem>>) attributes {dimension_semantics = [#tpu.dimension_semantics<parallel>, #tpu.dimension_semantics<parallel>], iteration_bounds = array<i64: 2, 2>, scalar_prefetch = 0 : i64, scratch_operands = 0 : i64, tpu.core_type = #tpu.core_type<tc>, window_params = [{transform_indices = @transform_0, window_bounds = array<i64: 3, 1, 8, 16>}, {transform_indices = @transform_1, window_bounds = array<i64: 1, 16, 32>}, {pipeline_mode = #tpu.pipeline_mode<synchronous>, transform_indices = @transform_2, window_bounds = array<i64: 32, 96>}, {pipeline_mode = #tpu.pipeline_mode<synchronous>, transform_indices = @transform_3, window_bounds = array<i64: 32, 32>}, {pipeline_mode = #tpu.pipeline_mode<synchronous>, transform_indices = @transform_4, window_bounds = array<i64: 32, 32>}, {pipeline_mode = #tpu.pipeline_mode<synchronous>, transform_indices = @transform_5, window_bounds = array<i64: 32, 32>}, {pipeline_mode = #tpu.pipeline_mode<synchronous>, transform_indices = @transform_6, window_bounds = array<i64: 1, 96>}, {pipeline_mode = #tpu.pipeline_mode<synchronous>, transform_indices = @transform_7, window_bounds = array<i64: 1, 32>}, {pipeline_mode = #tpu.pipeline_mode<synchronous>, transform_indices = @transform_8, window_bounds = array<i64: 1, 32>}, {pipeline_mode = #tpu.pipeline_mode<synchronous>, transform_indices = @transform_9, window_bounds = array<i64: 1, 32>}, {transform_indices = @transform_10, window_bounds = array<i64: 1, 8, 32>}]} {
    %c0 = arith.constant 0 : index
    %c0_0 = arith.constant 0 : index
    %c0_1 = arith.constant 0 : index
    %c0_2 = arith.constant 0 : index
    %0 = vector.load %arg2[%c0, %c0_0, %c0_1, %c0_2] : memref<3x1x8x16xbf16, #tpu.memory_space<vmem>>, vector<3x1x8x16xbf16>
    %1 = vector.shape_cast %0 : vector<3x1x8x16xbf16> to vector<3x8x16xbf16>
    %c0_3 = arith.constant 0 : index
    %c0_4 = arith.constant 0 : index
    %c0_5 = arith.constant 0 : index
    %2 = vector.load %arg3[%c0_3, %c0_4, %c0_5] : memref<1x16x32xbf16, #tpu.memory_space<vmem>>, vector<1x16x32xbf16>
    %3 = tpu.concatenate %2, %2, %2 in 0 : vector<1x16x32xbf16>, vector<1x16x32xbf16>, vector<1x16x32xbf16> -> vector<3x16x32xbf16>
    "tpu.trace_start"() <{level = 10 : i32, message = "kin,knd->kid"}> : () -> ()
    %cst = arith.constant dense<0.000000e+00> : vector<3x8x32xf32>
    %4 = tpu.matmul %1, %3, %cst {dimension_numbers = #tpu.dot_dimension_numbers<[2], [1], [1], [2], [0, 0, 0, 1, 1, 2], [0], [0]>} : vector<3x8x16xbf16>, vector<3x16x32xbf16>, vector<3x8x32xf32> -> vector<3x8x32xf32>
    "tpu.trace_stop"() : () -> ()
    %5 = vector.shape_cast %4 : vector<3x8x32xf32> to vector<24x32xf32>
    %6 = arith.truncf %5 : vector<24x32xf32> to vector<24x32xbf16>
    %c0_6 = arith.constant 0 : index
    %c0_7 = arith.constant 0 : index
    %7 = vector.load %arg4[%c0_6, %c0_7] : memref<32x96xbf16, #tpu.memory_space<vmem>>, vector<32x96xbf16>
    %cst_8 = arith.constant dense<0.000000e+00> : vector<24x96xf32>
    %8 = tpu.matmul %6, %7, %cst_8 {dimension_numbers = #tpu.dot_dimension_numbers<[1], [0], [0], [1], [0, 0, 1, 1], [], []>} : vector<24x32xbf16>, vector<32x96xbf16>, vector<24x96xf32> -> vector<24x96xf32>
    %c0_9 = arith.constant 0 : index
    %c0_10 = arith.constant 0 : index
    %9 = vector.load %arg8[%c0_9, %c0_10] : memref<1x96xf32, #tpu.memory_space<vmem>>, vector<1x96xf32>
    %10 = vector.broadcast %9 : vector<1x96xf32> to vector<24x96xf32>
    %11 = arith.addf %8, %10 : vector<24x96xf32>
    %12 = vector.shape_cast %11 : vector<24x96xf32> to vector<3x8x96xf32>
    %13 = vector.extract_strided_slice %12 {offsets = [0, 0, 0], sizes = [3, 8, 32], strides = [1, 1, 1]} : vector<3x8x96xf32> to vector<3x8x32xf32>
    %14 = vector.extract_strided_slice %12 {offsets = [0, 0, 32], sizes = [3, 8, 32], strides = [1, 1, 1]} : vector<3x8x96xf32> to vector<3x8x32xf32>
    %15 = vector.extract_strided_slice %12 {offsets = [0, 0, 64], sizes = [3, 8, 32], strides = [1, 1, 1]} : vector<3x8x96xf32> to vector<3x8x32xf32>
    %c0_11 = arith.constant 0 : index
    %c0_12 = arith.constant 0 : index
    %16 = vector.load %arg9[%c0_11, %c0_12] : memref<1x32xf32, #tpu.memory_space<vmem>>, vector<1x32xf32>
    %17 = vector.shape_cast %16 : vector<1x32xf32> to vector<1x32xf32>
    %18 = vector.broadcast %17 : vector<1x32xf32> to vector<8x32xf32>
    %c0_13 = arith.constant 0 : index
    %c0_14 = arith.constant 0 : index
    %19 = vector.load %arg5[%c0_13, %c0_14] : memref<32x32xbf16, #tpu.memory_space<vmem>>, vector<32x32xbf16>
    %c0_15 = arith.constant 0 : index
    %c0_16 = arith.constant 0 : index
    %20 = vector.load %arg6[%c0_15, %c0_16] : memref<32x32xbf16, #tpu.memory_space<vmem>>, vector<32x32xbf16>
    %c0_17 = arith.constant 0 : index
    %c0_18 = arith.constant 0 : index
    %21 = vector.load %arg7[%c0_17, %c0_18] : memref<32x32xbf16, #tpu.memory_space<vmem>>, vector<32x32xbf16>
    %cst_19 = arith.constant 0.000000e+00 : f32
    %22 = vector.broadcast %cst_19 : f32 to vector<8x32xf32>
    %cst_20 = arith.constant 0.000000e+00 : f32
    %23 = vector.broadcast %cst_20 : f32 to vector<8x32xf32>
    %24 = arith.truncf %22 : vector<8x32xf32> to vector<8x32xbf16>
    %cst_21 = arith.constant dense<0.000000e+00> : vector<8x32xf32>
    %25 = tpu.matmul %24, %19, %cst_21 {dimension_numbers = #tpu.dot_dimension_numbers<[1], [0], [0], [1], [0, 0, 1, 1], [], []>} : vector<8x32xbf16>, vector<32x32xbf16>, vector<8x32xf32> -> vector<8x32xf32>
    %cst_22 = arith.constant dense<0.000000e+00> : vector<8x32xf32>
    %26 = tpu.matmul %24, %20, %cst_22 {dimension_numbers = #tpu.dot_dimension_numbers<[1], [0], [0], [1], [0, 0, 1, 1], [], []>} : vector<8x32xbf16>, vector<32x32xbf16>, vector<8x32xf32> -> vector<8x32xf32>
    %cst_23 = arith.constant dense<0.000000e+00> : vector<8x32xf32>
    %27 = tpu.matmul %24, %21, %cst_23 {dimension_numbers = #tpu.dot_dimension_numbers<[1], [0], [0], [1], [0, 0, 1, 1], [], []>} : vector<8x32xbf16>, vector<32x32xbf16>, vector<8x32xf32> -> vector<8x32xf32>
    %28 = arith.addf %27, %18 : vector<8x32xf32>
    %29 = vector.extract_strided_slice %13 {offsets = [0, 0, 0], sizes = [1, 8, 32], strides = [1, 1, 1]} : vector<3x8x32xf32> to vector<1x8x32xf32>
    %30 = vector.shape_cast %29 : vector<1x8x32xf32> to vector<8x32xf32>
    %31 = arith.addf %30, %25 : vector<8x32xf32>
    %32 = arith.negf %31 : vector<8x32xf32>
    %33 = math.exp %32 : vector<8x32xf32>
    %cst_24 = arith.constant 1.000000e+00 : f32
    %34 = vector.broadcast %cst_24 : f32 to vector<8x32xf32>
    %35 = arith.addf %34, %33 : vector<8x32xf32>
    %36 = arith.divf %34, %35 : vector<8x32xf32>
    %37 = vector.extract_strided_slice %14 {offsets = [0, 0, 0], sizes = [1, 8, 32], strides = [1, 1, 1]} : vector<3x8x32xf32> to vector<1x8x32xf32>
    %38 = vector.shape_cast %37 : vector<1x8x32xf32> to vector<8x32xf32>
    %39 = arith.addf %38, %26 : vector<8x32xf32>
    %40 = arith.negf %39 : vector<8x32xf32>
    %41 = math.exp %40 : vector<8x32xf32>
    %cst_25 = arith.constant 1.000000e+00 : f32
    %42 = vector.broadcast %cst_25 : f32 to vector<8x32xf32>
    %43 = arith.addf %42, %41 : vector<8x32xf32>
    %44 = arith.divf %42, %43 : vector<8x32xf32>
    %45 = vector.extract_strided_slice %15 {offsets = [0, 0, 0], sizes = [1, 8, 32], strides = [1, 1, 1]} : vector<3x8x32xf32> to vector<1x8x32xf32>
    %46 = vector.shape_cast %45 : vector<1x8x32xf32> to vector<8x32xf32>
    %47 = arith.mulf %36, %28 : vector<8x32xf32>
    %48 = arith.addf %46, %47 : vector<8x32xf32>
    %49 = math.tanh %48 : vector<8x32xf32>
    %cst_26 = arith.constant 1.000000e+00 : f32
    %50 = vector.broadcast %cst_26 : f32 to vector<8x32xf32>
    %51 = arith.subf %50, %44 : vector<8x32xf32>
    %52 = arith.mulf %51, %49 : vector<8x32xf32>
    %53 = arith.mulf %44, %22 : vector<8x32xf32>
    %54 = arith.addf %52, %53 : vector<8x32xf32>
    %55 = arith.addf %23, %54 : vector<8x32xf32>
    %56 = arith.truncf %54 : vector<8x32xf32> to vector<8x32xbf16>
    %cst_27 = arith.constant dense<0.000000e+00> : vector<8x32xf32>
    %57 = tpu.matmul %56, %19, %cst_27 {dimension_numbers = #tpu.dot_dimension_numbers<[1], [0], [0], [1], [0, 0, 1, 1], [], []>} : vector<8x32xbf16>, vector<32x32xbf16>, vector<8x32xf32> -> vector<8x32xf32>
    %cst_28 = arith.constant dense<0.000000e+00> : vector<8x32xf32>
    %58 = tpu.matmul %56, %20, %cst_28 {dimension_numbers = #tpu.dot_dimension_numbers<[1], [0], [0], [1], [0, 0, 1, 1], [], []>} : vector<8x32xbf16>, vector<32x32xbf16>, vector<8x32xf32> -> vector<8x32xf32>
    %cst_29 = arith.constant dense<0.000000e+00> : vector<8x32xf32>
    %59 = tpu.matmul %56, %21, %cst_29 {dimension_numbers = #tpu.dot_dimension_numbers<[1], [0], [0], [1], [0, 0, 1, 1], [], []>} : vector<8x32xbf16>, vector<32x32xbf16>, vector<8x32xf32> -> vector<8x32xf32>
    %60 = arith.addf %59, %18 : vector<8x32xf32>
    %61 = vector.extract_strided_slice %13 {offsets = [1, 0, 0], sizes = [1, 8, 32], strides = [1, 1, 1]} : vector<3x8x32xf32> to vector<1x8x32xf32>
    %62 = vector.shape_cast %61 : vector<1x8x32xf32> to vector<8x32xf32>
    %63 = arith.addf %62, %57 : vector<8x32xf32>
    %64 = arith.negf %63 : vector<8x32xf32>
    %65 = math.exp %64 : vector<8x32xf32>
    %cst_30 = arith.constant 1.000000e+00 : f32
    %66 = vector.broadcast %cst_30 : f32 to vector<8x32xf32>
    %67 = arith.addf %66, %65 : vector<8x32xf32>
    %68 = arith.divf %66, %67 : vector<8x32xf32>
    %69 = vector.extract_strided_slice %14 {offsets = [1, 0, 0], sizes = [1, 8, 32], strides = [1, 1, 1]} : vector<3x8x32xf32> to vector<1x8x32xf32>
    %70 = vector.shape_cast %69 : vector<1x8x32xf32> to vector<8x32xf32>
    %71 = arith.addf %70, %58 : vector<8x32xf32>
    %72 = arith.negf %71 : vector<8x32xf32>
    %73 = math.exp %72 : vector<8x32xf32>
    %cst_31 = arith.constant 1.000000e+00 : f32
    %74 = vector.broadcast %cst_31 : f32 to vector<8x32xf32>
    %75 = arith.addf %74, %73 : vector<8x32xf32>
    %76 = arith.divf %74, %75 : vector<8x32xf32>
    %77 = vector.extract_strided_slice %15 {offsets = [1, 0, 0], sizes = [1, 8, 32], strides = [1, 1, 1]} : vector<3x8x32xf32> to vector<1x8x32xf32>
    %78 = vector.shape_cast %77 : vector<1x8x32xf32> to vector<8x32xf32>
    %79 = arith.mulf %68, %60 : vector<8x32xf32>
    %80 = arith.addf %78, %79 : vector<8x32xf32>
    %81 = math.tanh %80 : vector<8x32xf32>
    %cst_32 = arith.constant 1.000000e+00 : f32
    %82 = vector.broadcast %cst_32 : f32 to vector<8x32xf32>
    %83 = arith.subf %82, %76 : vector<8x32xf32>
    %84 = arith.mulf %83, %81 : vector<8x32xf32>
    %85 = arith.mulf %76, %54 : vector<8x32xf32>
    %86 = arith.addf %84, %85 : vector<8x32xf32>
    %87 = arith.addf %55, %86 : vector<8x32xf32>
    %88 = arith.truncf %86 : vector<8x32xf32> to vector<8x32xbf16>
    %cst_33 = arith.constant dense<0.000000e+00> : vector<8x32xf32>
    %89 = tpu.matmul %88, %19, %cst_33 {dimension_numbers = #tpu.dot_dimension_numbers<[1], [0], [0], [1], [0, 0, 1, 1], [], []>} : vector<8x32xbf16>, vector<32x32xbf16>, vector<8x32xf32> -> vector<8x32xf32>
    %cst_34 = arith.constant dense<0.000000e+00> : vector<8x32xf32>
    %90 = tpu.matmul %88, %20, %cst_34 {dimension_numbers = #tpu.dot_dimension_numbers<[1], [0], [0], [1], [0, 0, 1, 1], [], []>} : vector<8x32xbf16>, vector<32x32xbf16>, vector<8x32xf32> -> vector<8x32xf32>
    %cst_35 = arith.constant dense<0.000000e+00> : vector<8x32xf32>
    %91 = tpu.matmul %88, %21, %cst_35 {dimension_numbers = #tpu.dot_dimension_numbers<[1], [0], [0], [1], [0, 0, 1, 1], [], []>} : vector<8x32xbf16>, vector<32x32xbf16>, vector<8x32xf32> -> vector<8x32xf32>
    %92 = arith.addf %91, %18 : vector<8x32xf32>
    %93 = vector.extract_strided_slice %13 {offsets = [2, 0, 0], sizes = [1, 8, 32], strides = [1, 1, 1]} : vector<3x8x32xf32> to vector<1x8x32xf32>
    %94 = vector.shape_cast %93 : vector<1x8x32xf32> to vector<8x32xf32>
    %95 = arith.addf %94, %89 : vector<8x32xf32>
    %96 = arith.negf %95 : vector<8x32xf32>
    %97 = math.exp %96 : vector<8x32xf32>
    %cst_36 = arith.constant 1.000000e+00 : f32
    %98 = vector.broadcast %cst_36 : f32 to vector<8x32xf32>
    %99 = arith.addf %98, %97 : vector<8x32xf32>
    %100 = arith.divf %98, %99 : vector<8x32xf32>
    %101 = vector.extract_strided_slice %14 {offsets = [2, 0, 0], sizes = [1, 8, 32], strides = [1, 1, 1]} : vector<3x8x32xf32> to vector<1x8x32xf32>
    %102 = vector.shape_cast %101 : vector<1x8x32xf32> to vector<8x32xf32>
    %103 = arith.addf %102, %90 : vector<8x32xf32>
    %104 = arith.negf %103 : vector<8x32xf32>
    %105 = math.exp %104 : vector<8x32xf32>
    %cst_37 = arith.constant 1.000000e+00 : f32
    %106 = vector.broadcast %cst_37 : f32 to vector<8x32xf32>
    %107 = arith.addf %106, %105 : vector<8x32xf32>
    %108 = arith.divf %106, %107 : vector<8x32xf32>
    %109 = vector.extract_strided_slice %15 {offsets = [2, 0, 0], sizes = [1, 8, 32], strides = [1, 1, 1]} : vector<3x8x32xf32> to vector<1x8x32xf32>
    %110 = vector.shape_cast %109 : vector<1x8x32xf32> to vector<8x32xf32>
    %111 = arith.mulf %100, %92 : vector<8x32xf32>
    %112 = arith.addf %110, %111 : vector<8x32xf32>
    %113 = math.tanh %112 : vector<8x32xf32>
    %cst_38 = arith.constant 1.000000e+00 : f32
    %114 = vector.broadcast %cst_38 : f32 to vector<8x32xf32>
    %115 = arith.subf %114, %108 : vector<8x32xf32>
    %116 = arith.mulf %115, %113 : vector<8x32xf32>
    %117 = arith.mulf %108, %86 : vector<8x32xf32>
    %118 = arith.addf %116, %117 : vector<8x32xf32>
    %119 = arith.addf %87, %118 : vector<8x32xf32>
    %cst_39 = arith.constant dense<0.000000e+00> : vector<8xf32>
    %120 = vector.multi_reduction <add>, %119, %cst_39 [1] : vector<8x32xf32> to vector<8xf32>
    %121 = vector.shape_cast %120 : vector<8xf32> to vector<8x1xf32>
    %cst_40 = arith.constant 3.200000e+01 : f32
    %122 = vector.broadcast %cst_40 : f32 to vector<8x1xf32>
    %123 = arith.divf %121, %122 : vector<8x1xf32>
    %124 = vector.broadcast %123 : vector<8x1xf32> to vector<8x32xf32>
    %125 = arith.subf %119, %124 : vector<8x32xf32>
    %126 = arith.mulf %125, %125 : vector<8x32xf32>
    %cst_41 = arith.constant dense<0.000000e+00> : vector<8xf32>
    %127 = vector.multi_reduction <add>, %126, %cst_41 [1] : vector<8x32xf32> to vector<8xf32>
    %128 = vector.shape_cast %127 : vector<8xf32> to vector<8x1xf32>
    %cst_42 = arith.constant 3.200000e+01 : f32
    %129 = vector.broadcast %cst_42 : f32 to vector<8x1xf32>
    %130 = arith.divf %128, %129 : vector<8x1xf32>
    %131 = vector.broadcast %123 : vector<8x1xf32> to vector<8x32xf32>
    %132 = arith.subf %119, %131 : vector<8x32xf32>
    %cst_43 = arith.constant 9.99999974E-6 : f32
    %133 = vector.broadcast %cst_43 : f32 to vector<8x1xf32>
    %134 = arith.addf %130, %133 : vector<8x1xf32>
    %135 = math.rsqrt %134 : vector<8x1xf32>
    %136 = vector.broadcast %135 : vector<8x1xf32> to vector<8x32xf32>
    %137 = arith.mulf %132, %136 : vector<8x32xf32>
    %c0_44 = arith.constant 0 : index
    %c0_45 = arith.constant 0 : index
    %138 = vector.load %arg10[%c0_44, %c0_45] : memref<1x32xf32, #tpu.memory_space<vmem>>, vector<1x32xf32>
    %139 = vector.broadcast %138 : vector<1x32xf32> to vector<8x32xf32>
    %140 = arith.mulf %137, %139 : vector<8x32xf32>
    %c0_46 = arith.constant 0 : index
    %c0_47 = arith.constant 0 : index
    %141 = vector.load %arg11[%c0_46, %c0_47] : memref<1x32xf32, #tpu.memory_space<vmem>>, vector<1x32xf32>
    %142 = vector.broadcast %141 : vector<1x32xf32> to vector<8x32xf32>
    %143 = arith.addf %140, %142 : vector<8x32xf32>
    %144 = vector.shape_cast %143 : vector<8x32xf32> to vector<1x8x32xf32>
    %c0_48 = arith.constant 0 : index
    %c0_49 = arith.constant 0 : index
    %c0_50 = arith.constant 0 : index
    %145 = vector.load %arg12[%c0_48, %c0_49, %c0_50] : memref<1x8x32xf32, #tpu.memory_space<vmem>>, vector<1x8x32xf32>
    tpu.vector_store %arg12[%c0_48, %c0_49, %c0_50], %144 {strides = array<i32>} : memref<1x8x32xf32, #tpu.memory_space<vmem>>, vector<1x8x32xf32>,
    return
  }
  func.func @transform_0(%arg0: i32, %arg1: i32) -> (i32, i32, i32, i32) {
    %c0_i32 = arith.constant 0 : i32
    %c0_i32_0 = arith.constant 0 : i32
    %c0_i32_1 = arith.constant 0 : i32
    return %c0_i32, %arg0, %arg1, %c0_i32_0 : i32, i32, i32, i32
  }
  func.func @transform_1(%arg0: i32, %arg1: i32) -> (i32, i32, i32) {
    %c0_i32 = arith.constant 0 : i32
    %c0_i32_0 = arith.constant 0 : i32
    %c0_i32_1 = arith.constant 0 : i32
    return %arg0, %c0_i32, %c0_i32_0 : i32, i32, i32
  }
  func.func @transform_2(%arg0: i32, %arg1: i32) -> (i32, i32) {
    %c0_i32 = arith.constant 0 : i32
    %c0_i32_0 = arith.constant 0 : i32
    %c0_i32_1 = arith.constant 0 : i32
    return %c0_i32, %c0_i32_0 : i32, i32
  }
  func.func @transform_3(%arg0: i32, %arg1: i32) -> (i32, i32) {
    %c0_i32 = arith.constant 0 : i32
    %c0_i32_0 = arith.constant 0 : i32
    %c0_i32_1 = arith.constant 0 : i32
    return %c0_i32, %c0_i32_0 : i32, i32
  }
  func.func @transform_4(%arg0: i32, %arg1: i32) -> (i32, i32) {
    %c0_i32 = arith.constant 0 : i32
    %c0_i32_0 = arith.constant 0 : i32
    %c0_i32_1 = arith.constant 0 : i32
    return %c0_i32, %c0_i32_0 : i32, i32
  }
  func.func @transform_5(%arg0: i32, %arg1: i32) -> (i32, i32) {
    %c0_i32 = arith.constant 0 : i32
    %c0_i32_0 = arith.constant 0 : i32
    %c0_i32_1 = arith.constant 0 : i32
    return %c0_i32, %c0_i32_0 : i32, i32
  }
  func.func @transform_6(%arg0: i32, %arg1: i32) -> (i32, i32) {
    %c0_i32 = arith.constant 0 : i32
    %c0_i32_0 = arith.constant 0 : i32
    %c0_i32_1 = arith.constant 0 : i32
    return %c0_i32, %c0_i32_0 : i32, i32
  }
  func.func @transform_7(%arg0: i32, %arg1: i32) -> (i32, i32) {
    %c0_i32 = arith.constant 0 : i32
    %c0_i32_0 = arith.constant 0 : i32
    %c0_i32_1 = arith.constant 0 : i32
    return %c0_i32, %c0_i32_0 : i32, i32
  }
  func.func @transform_8(%arg0: i32, %arg1: i32) -> (i32, i32) {
    %c0_i32 = arith.constant 0 : i32
    %c0_i32_0 = arith.constant 0 : i32
    %c0_i32_1 = arith.constant 0 : i32
    return %c0_i32, %c0_i32_0 : i32, i32
  }
  func.func @transform_9(%arg0: i32, %arg1: i32) -> (i32, i32) {
    %c0_i32 = arith.constant 0 : i32
    %c0_i32_0 = arith.constant 0 : i32
    %c0_i32_1 = arith.constant 0 : i32
    return %c0_i32, %c0_i32_0 : i32, i32
  }
  func.func @transform_10(%arg0: i32, %arg1: i32) -> (i32, i32, i32) {
    %c0_i32 = arith.constant 0 : i32
    %c0_i32_0 = arith.constant 0 : i32
    return %arg0, %arg1, %c0_i32 : i32, i32, i32
  }
}

</mosaic_0001>

<bundles_post_ra>
// kernel: tpu_custom_call.1
= control target key start
LH: loop header
LB: loop body
LE: loop exit
PB: predicated region body
PF: predicated region fallthrough
CT: control target
= control target key end

     0   :  { %s2714_s0 = inlined_call_operand.hbm [shape: bf16[3,2,16,16], index: 0, kind: input, shape index: {}]   ;;  %s2715_s1 = inlined_call_operand.hbm [shape: bf16[2,16,32], index: 1, kind: input, shape index: {}]   ;;  %s2716_s2 = inlined_call_operand.hbm [shape: bf16[32,96], index: 2, kind: input, shape index: {}]   ;;  %s2717_s3 = inlined_call_operand.hbm [shape: bf16[32,32], index: 3, kind: input, shape index: {}]   ;;  %s2718_s4 = inlined_call_operand.hbm [shape: bf16[32,32], index: 4, kind: input, shape index: {}]   ;;  %s2719_s5 = inlined_call_operand.vmem [shape: bf16[32,32], index: 5, kind: input, shape index: {}]   ;;  %s2720_s6 = inlined_call_operand.vmem [shape: f32[1,96], index: 6, kind: input, shape index: {}]   ;;  %s2721_s7 = inlined_call_operand.vmem [shape: f32[1,32], index: 7, kind: input, shape index: {}]   ;;  %s2722_s8 = inlined_call_operand.vmem [shape: f32[1,32], index: 8, kind: input, shape index: {}]   ;;  %s2723_s9 = inlined_call_operand.vmem [shape: f32[1,32], index: 9, kind: input, shape index: {}]   ;;  %s2724_s10 = inlined_call_operand.hbm [shape: f32[2,16,32], index: 10, kind: output, shape index: {}]  }
   0x1   :  { %2741 = sst [smem:[#allocation22_spill]] %s2714_s0 }
   0x2   :  { %2742 = sst [smem:[#allocation23_spill]] %s2716_s2 }
   0x3   :  { %2743 = sst [smem:[#allocation24_spill]] %s2717_s3 }
   0x4   :  { %2744 = sst [smem:[#allocation25_spill]] %s2718_s4 }
   0x5   :  { %2745 = sst [smem:[#allocation26_spill]] %s2719_s5 }
   0x6   :  { %2746 = sst [smem:[#allocation27_spill]] %s2720_s6 }
   0x7   :  { %2747 = sst [smem:[#allocation28_spill]] %s2721_s7 }
   0x8   :  { %2748 = sst [smem:[#allocation29_spill]] %s2722_s8 }
   0x9   :  { %2749 = sst [smem:[#allocation30_spill]] %s2723_s9 }
   0xa   :  { %2750 = sst [smem:[#allocation31_spill]] %s2724_s10 }
   0xb   :  { %15 = vsyncpa [#allocation3], 0 }
   0xc   :  { %17 = vsyncpa [#allocation3 + $0x1], 0 }
   0xd   :  { %18 = vsyncpa [#allocation6], 0 }
   0xe   :  { %20 = vsyncpa [#allocation6 + $0x1], 0 }
   0xf   :  { %21 = vsyncpa [#allocation9], 0 }
  0x10   :  { %22 = vsyncpa [#allocation4], 0 }
  0x11   :  { %24 = vsyncpa [#allocation4 + $0x1], 0  ;;  %s2162_s13 = smov 0   ;;  %s2164_s14 = smov 0  }
  0x12   :  { %s2166_s15 = smov 0   ;;  %s2168_s16 = smov 0  }
  0x13   :  { %s2170_s17 = smov 0   ;;  %s2172_s18 = smov 0  }
  0x14   :  { %s2174_s19 = smov 0   ;;  %s2176_s20 = smov 0  }
  0x15   :  { %s2178_s21 = smov 0   ;;  %s2180_s22 = smov 0  }
  0x16   :  { %s2182_s23 = smov 0  }
  0x17 LB: > { %2751 = sst [smem:[#allocation17_spill]] %s2062_s16  ;;  %s2216_s24 = sadd.s32 4294967295, %s2090_s23   ;;  %s2090_s23 = sphi %s2182_s23, %s30_s23   ;;  %s2086_s22 = sphi %s2180_s22, %s2805_s22   ;;  %s2082_s21 = sphi %s2178_s21, %s2804_s21   ;;  %s2078_s20 = sphi %s2176_s20, %s2803_s20   ;;  %s2074_s19 = sphi %s2174_s19, %s2802_s19   ;;  %s2070_s18 = sphi %s2172_s18, %s2801_s18   ;;  %s2066_s17 = sphi %s2170_s17, %s2800_s17   ;;  %s2062_s16 = sphi %s2168_s16, %s2799_s16   ;;  %s2058_s15 = sphi %s2166_s15, %s2798_s15   ;;  %s2054_s14 = sphi %s2164_s14, %s2797_s14   ;;  %s2050_s13 = sphi %s2162_s13, %s2796_s13  }
  0x18   : > { %2752 = sst [smem:[#allocation18_spill]] %s2074_s19  ;;  %s1434_s25 = sadd.s32 4294967294, %s2090_s23  }
  0x19   : > { %2753 = sst [smem:[#allocation19_spill]] %s2078_s20  ;;  %p64_p0 = scmp.ne.s32.totalorder %s2066_s17, %s2062_s16 }
  0x1a   : > { %p2728_p1 = scmp.eq.s32.totalorder %s2216_s24, 0  ;;  %p90_p2 = scmp.ne.s32.totalorder %s2054_s14, %s2050_s13 }
  0x1b   : > { %p290_p5 = scmp.eq.s32.totalorder %s1434_s25, 3  ;;  %p1435_p7 = scmp.ge.s32.totalorder %s2090_s23, 1 }
  0x1c   : > { %p2226_p4 = por %p2728_p1, %p64_p0  ;;  %p2232_p6 = por %p90_p2, %p2728_p1 }
  0x1d   : > { %p2237_p8 = por %p290_p5, %p64_p0  ;;  %p297_p9 = scmp.lt.s32.totalorder %s2090_s23, 5 }
  0x1e   : > { %s2754_s26 = scalar_select %p2226_p4, 1, 0 }
  0x1f   : > { %s2755_s27 = scalar_select %p2232_p6, 1, 0 }
  0x20   : > { %s2757_s28 = scalar_select %p2237_p8, 1, 0 }
  0x21   : > { %2756 = sst [smem:[#allocation20_spill]] %s2755_s27  ;;  %p2242_p10 = pnand %p1435_p7, %p297_p9 }
  0x22   : > { %2758 = sst [smem:[#allocation21_spill]] %s2757_s28  ;;  %s2092_s30 = smov [#allocation7]  }
  0x23   : > { %s2759_s29 = scalar_select %p2242_p10, 1, 0 }
  0x24   : > { %s309_s11 = sshll.u32 %s2092_s30, 4  ;;  %p1642_p11 = pneg %p2242_p10  ;;  %s2246_s11 = int_to_ptr.vmem [resolvable:$true] %s309_s11 }
  0x25   : > { %s2093_s13 = smov [#allocation8]   ;;  %s2094_s28 = smov [#allocation10]  }
  0x26   : > { %p2252_p12 = pnand %p1642_p11, %p2728_p1  ;;  %s322_s25 = sshll.u32 %s2093_s13, 4  ;;  %s2256_s25 = int_to_ptr.vmem [resolvable:$true] %s322_s25 }
  0x27   : > { %s2258_s16 = sshll.u32 %s2094_s28, 4  ;;  %s2761_s2 = sld [smem:[#allocation23_spill]]  ;;  %s336_s16 = int_to_ptr.vmem [resolvable:$true] %s2258_s16 }
  0x28   : > { %p2268_p0 = pneg %p2252_p12 }
  0x2d   : > { %s1812_s30 = scalar_lea.hbm %s2761_s2, 256 }
  0x2e   : > { %p1813_p13 = scmp.ne.s32.totalorder %s2761_s2, %s1812_s30  ;;  %p1819_p7 = scmp.lt.u32.totalorder %s1812_s30, %s2761_s2 }
  0x30   : > { %p1815_p2 = pnand %p2268_p0, %p1813_p13 }
  0x32   : > { %p1816_p5 = pneg %p1815_p2 }
  0x34   : > { %p1821_p9 = pnand %p1819_p7, %p1816_p5 }
  0x36   : > { %1824 = shalt.err (!%p1821_p9)
}
  0x37   : > { %s1825_s9 = scalar_lea.vmem %s2246_s11, 256  ;;  %p1833_p8 = scmp.lt.s32.totalorder %s2246_s11, %s2246_s11 }
  0x38   : > { %p1826_p11 = scmp.ne.s32.totalorder %s2246_s11, %s1825_s9  ;;  %p1834_p6 = scmp.lt.s32.totalorder %s1825_s9, %s1825_s9 }
  0x3a   : > { %p1828_p1 = pnand %p1826_p11, %p2268_p0  ;;  %p1835_p13 = por %p1834_p6, %p1833_p8 }
  0x3c   : > { %p1829_p3 = pneg %p1828_p1 }
  0x3e   : > { %p1836_p2 = pnand %p1835_p13, %p1829_p3 }
  0x40   : > { %1839 = shalt.err (!%p1836_p2)
}
  0x41   : > { %s2735_s10 = smov 64   ;;  %s2737_s19 = smov 4  }
  0x42   : > { %1645 = dma.hbm_to_vmem [thread:$0]  (!%p2252_p12), %s2761_s2, 256, %s2246_s11, [#allocation6], %s2735_s10, %s2735_s10, %s2737_s19  }
  0x43   : > { %s2763_s3 = sld [smem:[#allocation24_spill]] }
  0x49   : > { %s1840_s9 = scalar_lea.hbm %s2763_s3, 256 }
  0x4a   : > { %p1841_p1 = scmp.ne.s32.totalorder %s2763_s3, %s1840_s9  ;;  %p1847_p8 = scmp.lt.u32.totalorder %s1840_s9, %s2763_s3 }
  0x4c   : > { %p1843_p3 = pnand %p1841_p1, %p2268_p0 }
  0x4e   : > { %p1844_p6 = pneg %p1843_p3 }
  0x50   : > { %p1849_p5 = pnand %p1847_p8, %p1844_p6 }
  0x52   : > { %1852 = shalt.err (!%p1849_p5)
}
  0x53   : > { %s1853_s11 = scalar_lea.vmem %s2256_s25, 256  ;;  %p1861_p13 = scmp.lt.s32.totalorder %s2256_s25, %s2256_s25 }
  0x54   : > { %p1854_p7 = scmp.ne.s32.totalorder %s2256_s25, %s1853_s11  ;;  %p1862_p2 = scmp.lt.s32.totalorder %s1853_s11, %s1853_s11 }
  0x56   : > { %p1856_p9 = pnand %p1854_p7, %p2268_p0  ;;  %p1863_p1 = por %p1862_p2, %p1861_p13 }
  0x58   : > { %p1857_p11 = pneg %p1856_p9 }
  0x5a   : > { %p1864_p3 = pnand %p1863_p1, %p1857_p11 }
  0x5c   : > { %1867 = shalt.err (!%p1864_p3)
}
  0x5d   : > { %1648 = dma.hbm_to_vmem [thread:$0]  (!%p2252_p12), %s2763_s3, 256, %s2256_s25, [#allocation9], %s2735_s10, %s2735_s10, %s2737_s19  }
  0x5e   : > { %s2764_s4 = sld [smem:[#allocation25_spill]] }
  0x64   : > { %s1868_s20 = scalar_lea.hbm %s2764_s4, 256 }
  0x65   : > { %p1869_p6 = scmp.ne.s32.totalorder %s2764_s4, %s1868_s20  ;;  %p1875_p7 = scmp.lt.u32.totalorder %s1868_s20, %s2764_s4 }
  0x67   : > { %p1871_p8 = pnand %p1869_p6, %p2268_p0 }
  0x69   : > { %p1872_p5 = pneg %p1871_p8 }
  0x6b   : > { %p1877_p9 = pnand %p1875_p7, %p1872_p5 }
  0x6d   : > { %1880 = shalt.err (!%p1877_p9)
}
  0x6e   : > { %s1881_s11 = scalar_lea.vmem %s336_s16, 256  ;;  %p1889_p1 = scmp.lt.s32.totalorder %s336_s16, %s336_s16 }
  0x6f   : > { %p1882_p11 = scmp.ne.s32.totalorder %s336_s16, %s1881_s11  ;;  %p1890_p3 = scmp.lt.s32.totalorder %s1881_s11, %s1881_s11 }
  0x71   : > { %p1884_p13 = pnand %p1882_p11, %p2268_p0  ;;  %p1891_p4 = por %p1890_p3, %p1889_p1 }
  0x73   : > { %p1885_p2 = pneg %p1884_p13 }
  0x75   : > { %p1892_p10 = pnand %p1891_p4, %p1885_p2 }
  0x77   : > { %1895 = shalt.err (!%p1892_p10)
}
  0x78   : > { %1651 = dma.hbm_to_vmem [thread:$0]  (!%p2252_p12), %s2764_s4, 256, %s336_s16, [#allocation9], %s2735_s10, %s2735_s10, %s2737_s19  }
  0x79   : > { %s39_s8 = sadd.s32 1, %s2082_s21  ;;  %s42_s12 = sadd.s32 1, %s2086_s22 }
  0x7a   : > { %p40_p4 = scmp.ge.s32.totalorder %s39_s8, 2  ;;  %s51_s6 = sadd.s32 1, %s2070_s18 }
  0x7b   : > { %p58_p10 = scmp.ne.s32.totalorder %s2070_s18, %s2066_s17  ;;  %p2740_p0 = scmp.eq.s32.totalorder %s2090_s23, 0 }
  0x7c   : > { %s2807_s8 = smov (%p40_p4, %s39_s8), 0  ;;  %s2809_s12 = smov (!%p40_p4, %s42_s12), %s2086_s22 }
  0x7d   : > { %s47_s7 = ssub.s32 %s2082_s21, %s2807_s8  ;;  %p44_p6 = scmp.ge.s32.totalorder %s2809_s12, 2 }
  0x7e   : > { %p2765_p8 = scmp.eq.s32.totalorder %s2216_s24, 3  ;;  %p60_p12 = por %p2740_p0, %p58_p10 }
  0x7f   : > { %p2739_p7 = scmp.lt.s32.totalorder %s2090_s23, 4  ;;  %s2811_s12 = smov (%p44_p6, %s2809_s12), 0 }
  0x80   : > { %p2353_p5 = por %p2765_p8, %p58_p10  ;;  %s364_s27 = sand.u32 1, %s2070_s18  }
  0x81   : > { %s1440_s20 = sshll.u32 %s2086_s22, 1  ;;  %s2366_s30 = ssub.s32 %s2086_s22, %s2811_s12 }
  0x82   : > { %s48_s13 = sor.u32 %s47_s7, %s2366_s30  ;;  %s1622_s28 = smul.u32 12, %s364_s27 }
  0x83   : > { %p49_p11 = scmp.eq.s32.totalorder %s48_s13, 0  ;;  %s373_s9 = sadd.s32 %s2082_s21, %s1440_s20 }
  0x84   : > { %p2373_p13 = pnand %p2739_p7, %p60_p12  ;;  %s1441_s5 = sshll.u32 %s373_s9, 6 }
  0x85   : > { %s2378_s25 = scalar_select %p49_p11, %s2070_s18, %s51_s6  }
  0x86   : > { %s2768_s0 = sld [smem:[#allocation22_spill]]  ;;  %s368_s7 = scalar_lea.vmem [#allocation2], %s1622_s28 }
  0x87   : > { %s376_s20 = sshll.u32 %s368_s7, 4  ;;  %s2387_s13 = scalar_lea.sflag [#allocation3], %s364_s27  ;;  %s2385_s20 = int_to_ptr.vmem [resolvable:$true] %s376_s20 }
  0x88   : > { %p1898_p1 = pneg %p2373_p13 }
  0x8c   : > { %s2383_s2 = scalar_lea.hbm %s2768_s0, %s1441_s5  ;;  %s1901_s6 = scalar_lea.hbm %s2768_s0, 768 }
  0x8d   : > { %s1896_s3 = scalar_lea.hbm %s2383_s2, 192  ;;  %p1902_p10 = scmp.lt.u32.totalorder %s2383_s2, %s2768_s0 }
  0x8e   : > { %p1897_p2 = scmp.ne.s32.totalorder %s2383_s2, %s1896_s3  ;;  %p1903_p6 = scmp.lt.u32.totalorder %s1901_s6, %s1896_s3 }
  0x8f   : > { %p1905_p12 = scmp.lt.u32.totalorder %s1896_s3, %s2383_s2 }
  0x90   : > { %p1899_p3 = pnand %p1898_p1, %p1897_p2  ;;  %p1904_p8 = por %p1903_p6, %p1902_p10 }
  0x92   : > { %p1900_p4 = pneg %p1899_p3  ;;  %p1906_p11 = por %p1905_p12, %p1904_p8 }
  0x94   : > { %p1907_p7 = pnand %p1906_p11, %p1900_p4 }
  0x96   : > { %1910 = shalt.err (!%p1907_p7)
}
  0x97   : > { %s1911_s27 = scalar_lea.vmem %s2385_s20, 192  ;;  %s2097_s28 = smov [#allocation2]  }
  0x98   : > { %p1912_p2 = scmp.ne.s32.totalorder %s2385_s20, %s1911_s27  ;;  %s1916_s7 = sshll.u32 %s2097_s28, 4  ;;  %s1917_s7 = int_to_ptr.vmem [resolvable:$false] %s1916_s7 }
  0x99   : > { %s1918_s10 = scalar_lea.vmem %s1917_s7, 384  ;;  %p1919_p9 = scmp.lt.s32.totalorder %s2385_s20, %s1917_s7 }
  0x9a   : > { %p1914_p3 = pnand %p1912_p2, %p1898_p1  ;;  %p1920_p10 = scmp.lt.s32.totalorder %s1918_s10, %s1911_s27 }
  0x9c   : > { %p1915_p0 = pneg %p1914_p3  ;;  %p1921_p6 = por %p1920_p10, %p1919_p9 }
  0x9e   : > { %p1922_p8 = pnand %p1921_p6, %p1915_p0 }
  0xa0   : > { %1925 = shalt.err (!%p1922_p8)
}
  0xa1   : > { %s2098_s3 = smov 256   ;;  %s2769_s19 = smov 4  }
  0xa2   : > { %s2770_s6 = smov 64   ;;  %s386_s9 = sand.u32 1, %s2090_s23  }
  0xa3   : > { %1655 = dma.hbm_to_vmem [thread:$0]  (!%p2373_p13), %s2383_s2, 192, %s2385_s20, %s2387_s13, %s2098_s3, %s2770_s6, %s2769_s19  }
  0xa4   : > { %s77_s5 = sadd.s32 1, %s2058_s15  ;;  %p84_p0 = scmp.ne.s32.totalorder %s2058_s15, %s2054_s14 }
  0xa5   : > { %p2771_p7 = scmp.eq.s32.totalorder %s2366_s30, 0  ;;  %p2772_p9 = scmp.eq.s32.totalorder %s2090_s23, 0 }
  0xa6   : > { %s388_s27 = sand.u32 1, %s2058_s15   ;;  %s1486_s28 = sshll.u32 %s2086_s22, 7 }
  0xa7   : > { %s2424_s11 = scalar_select %p2771_p7, %s2058_s15, %s77_s5  }
  0xa8   : > { %p86_p1 = por %p84_p0, %p2772_p9  ;;  %s1442_s7 = sshll.u32 %s388_s27, 3 }
  0xa9   : > { %s2433_s4 = scalar_lea.hbm %s2715_s1, %s1486_s28  ;;  %p2773_p4 = scmp.lt.s32.totalorder %s2090_s23, 4 }
  0xaa   : > { %s390_s30 = scalar_lea.vmem [#allocation5], %s1442_s7  ;;  %s2443_s13 = scalar_lea.sflag [#allocation6], %s386_s9 }
  0xab   : > { %p2437_p13 = pnand %p2773_p4, %p86_p1  ;;  %s397_s20 = sshll.u32 %s390_s30, 4  ;;  %s2441_s20 = int_to_ptr.vmem [resolvable:$true] %s397_s20 }
  0xac   : > { %s1926_s0 = scalar_lea.hbm %s2433_s4, 128  ;;  %s1931_s27 = scalar_lea.hbm %s2715_s1, 256 }
  0xad   : > { %p1927_p12 = scmp.ne.s32.totalorder %s2433_s4, %s1926_s0  ;;  %p1928_p11 = pneg %p2437_p13 }
  0xae   : > { %p1932_p10 = scmp.lt.u32.totalorder %s2433_s4, %s2715_s1  ;;  %p1933_p6 = scmp.lt.u32.totalorder %s1931_s27, %s1926_s0 }
  0xaf   : > { %p1929_p2 = pnand %p1928_p11, %p1927_p12  ;;  %p1935_p0 = scmp.lt.u32.totalorder %s1926_s0, %s2433_s4 }
  0xb0   : > { %p1934_p8 = por %p1933_p6, %p1932_p10 }
  0xb1   : > { %p1930_p3 = pneg %p1929_p2 }
  0xb2   : > { %p1936_p7 = por %p1935_p0, %p1934_p8 }
  0xb4   : > { %p1937_p9 = pnand %p1936_p7, %p1930_p3 }
  0xb6   : > { %1940 = shalt.err (!%p1937_p9)
}
  0xb7   : > { %s1941_s9 = scalar_lea.vmem %s2441_s20, 128  ;;  %s2099_s7 = smov [#allocation5]  }
  0xb8   : > { %p1942_p1 = scmp.ne.s32.totalorder %s2441_s20, %s1941_s9  ;;  %s1946_s30 = sshll.u32 %s2099_s7, 4  ;;  %s1947_s30 = int_to_ptr.vmem [resolvable:$false] %s1946_s30 }
  0xb9   : > { %s1948_s3 = scalar_lea.vmem %s1947_s30, 256  ;;  %p1949_p2 = scmp.lt.s32.totalorder %s2441_s20, %s1947_s30 }
  0xba   : > { %p1944_p4 = pnand %p1942_p1, %p1928_p11  ;;  %p1950_p10 = scmp.lt.s32.totalorder %s1948_s3, %s1941_s9 }
  0xbc   : > { %p1945_p12 = pneg %p1944_p4  ;;  %p1951_p6 = por %p1950_p10, %p1949_p2 }
  0xbe   : > { %p1952_p8 = pnand %p1951_p6, %p1945_p12 }
  0xc0   : > { %1955 = shalt.err (!%p1952_p8)
}
  0xc1   : > { %1658 = dma.hbm_to_vmem [thread:$0]  (!%p2437_p13), %s2433_s4, 128, %s2441_s20, %s2443_s13, %s2770_s6, %s2770_s6, %s2769_s19  }
  0xc2   : > { %p2775_p11 = scmp.ne.s32.totalorder %s2759_s29, 0 }
  0xc3   : > { %s2477_s0 = sand.u32 (!%p2775_p11), 1, %s2066_s17   ;;  %p2776_p3 = scmp.ne.s32.totalorder (!%p2775_p11), %s2754_s26, 0 }
  0xc4   : > { %409 = sbr.rel (%p2775_p11) target bundleno = 2825 (0xb09), region = 60  ;;  %s412_s27 = scalar_lea.sflag (!%p2775_p11), [#allocation3], %s2477_s0 }
  0xc5   : > { %s1623_s5 = smul.u32 (!%p2775_p11), 12, %s2477_s0 }
  0xc7   : > { %s2481_s28 = scalar_lea.vmem (!%p2775_p11), [#allocation2], %s1623_s5 }
  0xcb   : > { %2029 = dma.done.wait (%p2776_p3), %s412_s27, 192  }
  0xcc   : > { %2031 = vsyncadd (%p2776_p3), %s412_s27, 4294967104  ;;  %s2777_s4 = sld [smem:[#allocation20_spill]]  ;;  %s420_s29 = sand.u32 1, %s2216_s24  }
  0xcd   : > { %s422_s19 = sand.u32 1, %s2054_s14   ;;  %s421_s2 = scalar_lea.sflag [#allocation6], %s420_s29 }
  0xce   : > { %s1446_s6 = sshll.u32 %s422_s19, 3 }
  0xcf   : > { %s424_s20 = scalar_lea.vmem [#allocation5], %s1446_s6 }
  0xd2   : > { %p2778_p13 = scmp.ne.s32.totalorder %s2777_s4, 0 }
  0xd4   : > { %2033 = dma.done.wait (%p2778_p13), %s421_s2, 128  }
  0xd5   : > { %2035 = vsyncadd (%p2778_p13), %s421_s2, 4294967168  ;;  %p2779_p0 = scmp.eq.s32.totalorder %s2216_s24, 0 }
  0xd7   : > { %2037 = dma.done.wait (%p2779_p0), [#allocation6], 256   ;;  %p2780_p7 = pmov %p2779_p0 }
  0xd8   : > { %p2781_p9 = pmov %p2779_p0 }
  0xd9   : > { %2039 = vsyncadd (%p2780_p7), [#allocation6], 4294967040 }
  0xda   : > { %2041 = dma.done.wait (%p2781_p9), [#allocation9], 512   ;;  %p2782_p1 = pmov %p2779_p0 }
  0xdb   : > { %v2100_v0 = vmov 0.0   ;;  %vm2101_vm0 = vmmov 0   ;;  %v1771_v1 = vld [vmem:[%s424_s20] sm:$0xff]   ;;  %v479_v2 = vld [vmem:[%s2481_s28] sm:$0xf]  ;;  %vm490_vm1 = vcmask 130048  }
  0xdc   : > { %2043 = vsyncadd (%p2782_p1), [#allocation9], 4294966784  ;;  %1524 = vmatprep.subr.bf16.mxu0 %v2100_v0  ;;  %1530 = vmatprep.subr.bf16.mxu1 %v2100_v0  ;;  %v480_v3 = vld [vmem:[%s2481_s28 + $0x4] sm:$0xf]  ;;  %v481_v4 = vld [vmem:[%s2481_s28 + $0x8] sm:$0xf] }
  0xdd   : > { %1526 = vmatprep.mubr.msk.bf16.mxu0 %vm2101_vm0, %v2100_v0  ;;  %1532 = vmatprep.mubr.msk.bf16.mxu1 %vm2101_vm0, %v2100_v0  ;;  %v1772_v5 = vld [vmem:[#allocation7] sm:$0xff]   ;;  %v2516_v6 = vld [vmem:[#allocation8] sm:$0xff]   ;;  %v1774_v7 = vld [vmem:[#allocation7 + $0x8] sm:$0xff]   ;;  %v2102_v9 = vmov 0   ;;  %s2783_s13 = sld [smem:[#allocation26_spill]]  ;;  %vm645_vm2 = vcmask 261120  }
  0xde   : > { %1525 = vmatpush3.bf16.msra.mxu0 %v1771_v1  ;;  %1531 = vmatpush3.bf16.msra.mxu1 %v1771_v1  ;;  %v2520_v8 = vld [vmem:[#allocation8 + $0x8] sm:$0xff]   ;;  %v2541_v12 = vld [vmem:[#allocation10] sm:$0xff]   ;;  %v2547_v13 = vld [vmem:[#allocation10 + $0x8] sm:$0xff]   ;;  %s2785_s5 = sld [smem:[#allocation27_spill]]  ;;  %s2786_s4 = sld [smem:[#allocation28_spill]] }
  0xdf   : > { %1536 = vmatprep.subr.bf16.mxu0 %v2100_v0  ;;  %1542 = vmatprep.subr.bf16.mxu1 %v1772_v5  ;;  %s2103_s29 = smov 64   ;;  %s2104_s19 = smov 32  }
  0xe0   : > { %s2105_s6 = smov 96   ;;  %s2787_s24 = sld [smem:[#allocation29_spill]] }
  0xe1   : > { %1527 = vmatmul.mubr.msk.bf16.vlgmr.msra.gmra.mrb[0].mxu0 %vm490_vm1, %v479_v2  ;;  %1533 = vmatmul.mubr.msk.bf16.vlgmr.msra.gmra.mrb[0].mxu1 %vm490_vm1, %v480_v3  ;;  %s2788_s26 = sld [smem:[#allocation19_spill]]  ;;  %s2789_s7 = sld [smem:[#allocation30_spill]] }
  0xe2   : > { %1537 = vmatpush3.bf16.msra.mxu0 %v1771_v1  ;;  %1538 = vmatprep.mubr.msk.bf16.mxu0 %vm2101_vm0, %v2100_v0  ;;  %s2790_s30 = sld [smem:[#allocation18_spill]]  ;;  %s1450_s3 = sshll.u32 %s2477_s0, 3 }
  0xe3   : > { %1550 = vmatprep.subr.bf16.mxu0 %v2100_v0  ;;  %1543 = vmatpush3.bf16.msra.mxu1 %v1772_v5  ;;  %s2784_s10 = smov %s2783_s13  ;;  %v2528_v10 = vld [vmem:[%s2783_s13] sm:$0xff]   ;;  %s2791_s20 = sld [smem:[#allocation31_spill]] }
  0xe4   : > { %1544 = vmatprep.subr.bf16.mxu1 %v1774_v7  ;;  %v2536_v11 = vld [vmem:[%s2784_s10 + $0x8] sm:$0xff]   ;;  %v1455_v36 = vld [vmem:[%s2785_s5] ss:$0 sm:$0xff] }
  0xe5   : > { %v2575_v52 = vld [vmem:[%s2786_s4] ss:$0 sm:$0xff]  ;;  %s477_s4 = scalar_lea.vmem [#allocation11], %s1450_s3 }
  0xe7   : > { %1545 = vmatpush3.bf16.msra.mxu1 %v1774_v7  ;;  %s1482_s5 = sshll.u32 %s2788_s26, 1  ;;  %s2106_s26 = smov [#allocation11]  }
  0xe8   : > { %1558 = vmatprep.subr.bf16.mxu1 %v2100_v0  ;;  %s1293_s27 = sadd.s32 %s2790_s30, %s1482_s5 }
  0xe9   : > { %1539 = vmatmul.mubr.msk.bf16.vlgmr.msra.gmra.mrb[4].mxu0 %vm490_vm1, %v481_v4  ;;  %s1483_s28 = sshll.u32 %s1293_s27, 7 }
  0xea   : > { %1554 = vmatprep.mubr.msk.bf16.mxu0 %vm2101_vm0, %v2100_v0  ;;  %1551 = vmatpush3.bf16.msra.mxu0 %v2516_v6  ;;  %s2650_s13 = scalar_lea.hbm %s2791_s20, %s1483_s28 }
  0xeb   : > { %1552 = vmatprep.subr.bf16.mxu0 %v2100_v0 }
  0xee   : > { %1553 = vmatpush3.bf16.msra.mxu0 %v2520_v8 }
  0xef   : > { %1566 = vmatprep.subr.bf16.mxu0 %v2100_v0 }
  0xf1   : > { %1555 = vmatmul.mubr.bf16.vlgmr.msra.gmra.mrb[8].mxu0 %v2102_v9 }
  0xf2   : > { %1570 = vmatprep.mubr.msk.bf16.mxu0 %vm2101_vm0, %v2100_v0  ;;  %1567 = vmatpush3.bf16.msra.mxu0 %v2528_v10 }
  0xf3   : > { %1568 = vmatprep.subr.bf16.mxu0 %v2100_v0 }
  0xf6   : > { %1569 = vmatpush3.bf16.msra.mxu0 %v2536_v11 }
  0xf7   : > { %1582 = vmatprep.subr.bf16.mxu0 %v2100_v0 }
  0xf9   : > { %1571 = vmatmul.mubr.bf16.vlgmr.msra.gmra.mrb[12].mxu0 %v2102_v9 }
  0xfa   : > { %1583 = vmatpush3.bf16.msra.mxu0 %v2541_v12  ;;  %1586 = vmatprep.mubr.msk.bf16.mxu0 %vm2101_vm0, %v2100_v0 }
  0xfb   : > { %1584 = vmatprep.subr.bf16.mxu0 %v2100_v0 }
  0xfe   : > { %1585 = vmatpush3.bf16.msra.mxu0 %v2547_v13 }
  0xff   : > { %1598 = vmatprep.subr.bf16.mxu0 %v2100_v0 }
 0x1b4   : > { %v528_v14 = vpop.f32.mrb[0].mxu0  ;;  %v571_v15 = vpop.f32.mrb[0].mxu1 }
 0x1b5   : > { %v1528_v16 = vpop.f32.mrb[1].mxu0  ;;  %v620_v17 = vpack.c.bf16 %v571_v15, %v528_v14  ;;  %v1534_v18 = vpop.f32.mrb[1].mxu1 }
 0x1b6   : > { %v531_v19 = vpop.f32.mrb[2].mxu0  ;;  %v574_v20 = vpop.f32.mrb[2].mxu1 }
 0x1b7   : > { %v1529_v21 = vpop.f32.mrb[3].mxu0  ;;  %1546 = vmatprep.mubr.msk.bf16.mxu1 %vm645_vm2, %v620_v17  ;;  %v1535_v22 = vpop.f32.mrb[3].mxu1 }
 0x1bc   : > { %v614_v23 = vpop.f32.mrb[4].mxu0 }
 0x1bd   : > { %v621_v24 = vpack.c.bf16 %v614_v23, %v614_v23  ;;  %v1540_v25 = vpop.f32.mrb[5].mxu0 }
 0x1be   : > { %v617_v26 = vpop.f32.mrb[6].mxu0 }
 0x1bf   : > { %v1541_v27 = vpop.f32.mrb[7].mxu0  ;;  %1547 = vmatmul.mubr.msk.bf16.vlgmr.msra.gmra.mrb[4].mxu1 %vm645_vm2, %v621_v24 }
 0x1c0   : > { %1559 = vmatpush3.bf16.msra.mxu1 %v2541_v12  ;;  %1562 = vmatprep.mubr.msk.bf16.mxu1 %vm2101_vm0, %v2100_v0 }
 0x1c1   : > { %1560 = vmatprep.subr.bf16.mxu1 %v2100_v0 }
 0x1c4   : > { %1561 = vmatpush3.bf16.msra.mxu1 %v2547_v13  ;;  %v768_v28 = vpop.f32.mrb[8].mxu0 }
 0x1c5   : > { %1574 = vmatprep.subr.bf16.mxu1 %v2100_v0  ;;  %v1556_v29 = vpop.f32.mrb[9].mxu0 }
 0x1c6   : > { %v771_v30 = vpop.f32.mrb[10].mxu0 }
 0x1c7   : > { %1563 = vmatmul.mubr.bf16.vlgmr.msra.gmra.mrb[8].mxu1 %v2102_v9  ;;  %v1557_v31 = vpop.f32.mrb[11].mxu0 }
 0x1c8   : > { %1575 = vmatpush3.bf16.msra.mxu1 %v2516_v6  ;;  %1578 = vmatprep.mubr.msk.bf16.mxu1 %vm2101_vm0, %v2100_v0 }
 0x1c9   : > { %1576 = vmatprep.subr.bf16.mxu1 %v2100_v0 }
 0x1cc   : > { %1577 = vmatpush3.bf16.msra.mxu1 %v2520_v8  ;;  %v872_v32 = vpop.f32.mrb[12].mxu0 }
 0x1cd   : > { %1590 = vmatprep.subr.bf16.mxu1 %v2100_v0  ;;  %v1572_v33 = vpop.f32.mrb[13].mxu0  ;;  %v873_v53 = vadd.f32 %v2575_v52, %v872_v32 }
 0x1ce   : > { %v875_v34 = vpop.f32.mrb[14].mxu0 }
 0x1cf   : > { %v1573_v35 = vpop.f32.mrb[15].mxu0 }
 0x292   : > { %v1548_v37 = vpop.f32.mrb[4].mxu1 }
 0x293   : > { %v2568_v38 = vadd.f32 %v1548_v37, %v1455_v36  ;;  %v686_v39 = vpop.f32.mrb[5].mxu1 }
 0x294   : > { %v687_v40 = vadd.f32 %v1455_v36, %v686_v39  ;;  %v1549_v41 = vpop.f32.mrb[6].mxu1 }
 0x295   : > { %v689_v42 = vpop.f32.mrb[7].mxu1 }
 0x296   : > { %v878_v43 = vadd.f32 %v768_v28, %v687_v40  ;;  %v2570_v44 = vadd.f32 %v1455_v36, %v689_v42 }
 0x298   : > { %v1467_v45 = vmul.f32 -1.442695, %v878_v43 }
 0x29a   : > { %1780 = vpow2.f32 %v1467_v45  ;;  %v820_v46 = vpop.f32.mrb[8].mxu1 }
 0x29b   : > { %v1564_v47 = vpop.f32.mrb[9].mxu1 }
 0x29c   : > { %v823_v48 = vpop.f32.mrb[10].mxu1 }
 0x29d   : > { %v1565_v49 = vpop.f32.mrb[11].mxu1 }
 0x2a4   : > { %v1781_v50 = vpop.eup %1780 }
 0x2a5   : > { %v882_v51 = vadd.f32 1.0, %v1781_v50 }
 0x2a7   : > { %1782 = vrcp.f32 %v882_v51 }
 0x2b1   : > { %v1783_v54 = vpop.eup %1782 }
 0x2b2   : > { %v896_v55 = vmul.f32 %v1783_v54, %v873_v53 }
 0x2b4   : > { %898 = vrot.lane.b32.xlu0 %v896_v55, %s2103_s29 }
 0x2b8   : > { %886 = vrot.lane.b32.xlu0 %v820_v46, %s2104_s19 }
 0x326   : > { %v899_v56 = vpop.permute.xlu0 %898 }
 0x327   : > { %v901_v57 = vadd.f32 %v899_v56, %v687_v40 }
 0x329   : > { %1784 = vtanh.f32 %v901_v57 }
 0x32a   : > { %v887_v59 = vpop.permute.xlu0 %886 }
 0x32b   : > { %v889_v60 = vadd.f32 %v887_v59, %v687_v40 }
 0x32d   : > { %v1468_v61 = vmul.f32 -1.442695, %v889_v60 }
 0x32f   : > { %1786 = vpow2.f32 %v1468_v61 }
 0x333   : > { %v1785_v58 = vpop.eup %1784 }
 0x334   : > { %905 = vrot.lane.b32.xlu1 %v1785_v58, %s2105_s6 }
 0x339   : > { %v1787_v62 = vpop.eup %1786 }
 0x33a   : > { %v893_v63 = vadd.f32 1.0, %v1787_v62 }
 0x33c   : > { %1788 = vrcp.f32 %v893_v63 }
 0x346   : > { %v1789_v1 = vpop.eup %1788 }
 0x347   : > { %v903_v2 = vsub.f32 1.0, %v1789_v1  ;;  %v909_v5 = vmul.f32 0.0, %v1789_v1 }
 0x3a6   : > { %v906_v3 = vpop.permute.xlu1 %905 }
 0x3a7   : > { %v908_v4 = vmul.f32 %v906_v3, %v903_v2 }
 0x3a9   : > { %v2581_v7 = vadd.f32 %v909_v5, %v908_v4 }
 0x3ab   : > { %v912_v9 = vpack.c.bf16 %v2581_v7, %v2581_v7 }
 0x3ad   : > { %914 = vrot.lane.b32.xlu1 %v912_v9, %s2105_s6 }
 0x41f   : > { %v915_v14 = vpop.permute.xlu1 %914 }
 0x420   : > { %1579 = vmatmul.mubr.msk.bf16.vlgmr.msra.gmra.mrb[12].mxu1 %vm645_vm2, %v915_v14  ;;  %1587 = vmatmul.mubr.msk.bf16.vlgmr.msra.gmra.mrb[16].mxu0 %vm645_vm2, %v915_v14 }
 0x421   : > { %1591 = vmatpush3.bf16.msra.mxu1 %v2528_v10  ;;  %1594 = vmatprep.mubr.msk.bf16.mxu1 %vm2101_vm0, %v2100_v0 }
 0x422   : > { %1592 = vmatprep.subr.bf16.mxu1 %v2100_v0  ;;  %1599 = vmatpush3.bf16.msra.mxu0 %v2516_v6 }
 0x423   : > { %1600 = vmatprep.subr.bf16.mxu0 %v2100_v0  ;;  %1602 = vmatprep.mubr.msk.bf16.mxu0 %vm2101_vm0, %v2100_v0 }
 0x425   : > { %1593 = vmatpush3.bf16.msra.mxu1 %v2536_v11 }
 0x426   : > { %1606 = vmatprep.subr.bf16.mxu1 %v2100_v0  ;;  %1601 = vmatpush3.bf16.msra.mxu0 %v2520_v8 }
 0x427   : > { %1614 = vmatprep.subr.bf16.mxu0 %v2100_v0 }
 0x428   : > { %1595 = vmatmul.mubr.msk.bf16.vlgmr.msra.gmra.mrb[16].mxu1 %vm645_vm2, %v915_v14 }
 0x429   : > { %1607 = vmatpush3.bf16.msra.mxu1 %v2541_v12  ;;  %1610 = vmatprep.mubr.msk.bf16.mxu1 %vm2101_vm0, %v2100_v0 }
 0x42a   : > { %1608 = vmatprep.subr.bf16.mxu1 %v2100_v0 }
 0x42d   : > { %1609 = vmatpush3.bf16.msra.mxu1 %v2547_v13 }
 0x4f3   : > { %v953_v6 = vpop.f32.mrb[12].mxu1  ;;  %v993_v15 = vpop.f32.mrb[16].mxu0 }
 0x4f4   : > { %v1039_v16 = vadd.f32 %v953_v6, %v2570_v44  ;;  %v1580_v17 = vpop.f32.mrb[13].mxu1  ;;  %1047 = vrot.lane.b32.xlu1 %v993_v15, %s2104_s19  ;;  %v1588_v8 = vpop.f32.mrb[17].mxu0 }
 0x4f5   : > { %v956_v18 = vpop.f32.mrb[14].mxu1  ;;  %v996_v19 = vpop.f32.mrb[18].mxu0 }
 0x4f6   : > { %v1472_v20 = vmul.f32 -1.442695, %v1039_v16  ;;  %v1581_v21 = vpop.f32.mrb[15].mxu1  ;;  %v1589_v12 = vpop.f32.mrb[19].mxu0 }
 0x4f8   : > { %1790 = vpow2.f32 %v1472_v20 }
 0x4fb   : > { %v1033_v22 = vpop.f32.mrb[16].mxu1 }
 0x4fc   : > { %v1596_v23 = vpop.f32.mrb[17].mxu1  ;;  %v1034_v27 = vadd.f32 %v2575_v52, %v1033_v22 }
 0x4fd   : > { %v1036_v24 = vpop.f32.mrb[18].mxu1 }
 0x4fe   : > { %v1597_v25 = vpop.f32.mrb[19].mxu1 }
 0x502   : > { %v1791_v26 = vpop.eup %1790 }
 0x503   : > { %v1043_v13 = vadd.f32 1.0, %v1791_v26 }
 0x505   : > { %1792 = vrcp.f32 %v1043_v13  ;;  %v1480_v13 = vld [vmem:[%s2789_s7] ss:$0 sm:$0xff]  ;;  %s1960_s7 = sshll.u32 %s2106_s26, 4  ;;  %s1961_s7 = int_to_ptr.vmem [resolvable:$false] %s1960_s7 }
 0x506   : > { %s1962_s30 = scalar_lea.vmem %s1961_s7, 256 }
 0x50f   : > { %v1793_v28 = vpop.eup %1792 }
 0x510   : > { %v1057_v29 = vmul.f32 %v1793_v28, %v1034_v27 }
 0x512   : > { %1059 = vrot.lane.b32.xlu0 %v1057_v29, %s2103_s29 }
 0x566   : > { %v1048_v33 = vpop.permute.xlu1 %1047 }
 0x567   : > { %v1050_v34 = vadd.f32 %v1048_v33, %v2570_v44 }
 0x569   : > { %v1473_v35 = vmul.f32 -1.442695, %v1050_v34 }
 0x584   : > { %v1060_v30 = vpop.permute.xlu0 %1059 }
 0x585   : > { %v1062_v31 = vadd.f32 %v1060_v30, %v2570_v44 }
 0x587   : > { %1794 = vtanh.f32 %v1062_v31 }
 0x588   : > { %1796 = vpow2.f32 %v1473_v35 }
 0x591   : > { %v1795_v32 = vpop.eup %1794 }
 0x592   : > { %1066 = vrot.lane.b32.xlu0 %v1795_v32, %s2105_s6  ;;  %v1797_v36 = vpop.eup %1796 }
 0x593   : > { %v1054_v37 = vadd.f32 1.0, %v1797_v36 }
 0x595   : > { %1798 = vrcp.f32 %v1054_v37 }
 0x59f   : > { %v1799_v39 = vpop.eup %1798 }
 0x5a0   : > { %v1064_v40 = vsub.f32 1.0, %v1799_v39  ;;  %v1070_v43 = vmul.f32 %v1799_v39, %v2581_v7 }
 0x604   : > { %v1067_v41 = vpop.permute.xlu0 %1066 }
 0x605   : > { %v1069_v42 = vmul.f32 %v1067_v41, %v1064_v40 }
 0x607   : > { %v1071_v45 = vadd.f32 %v1070_v43, %v1069_v42 }
 0x609   : > { %v1073_v46 = vpack.c.bf16 %v1071_v45, %v1071_v45  ;;  %v1072_v19 = vadd.f32 %v1071_v45, %v2581_v7 }
 0x60b   : > { %1075 = vrot.lane.b32.xlu1 %v1073_v46, %s2105_s6 }
 0x67d   : > { %v1076_v47 = vpop.permute.xlu1 %1075 }
 0x67e   : > { %1603 = vmatmul.mubr.msk.bf16.vlgmr.msra.gmra.mrb[20].mxu0 %vm645_vm2, %v1076_v47  ;;  %1611 = vmatmul.mubr.msk.bf16.vlgmr.msra.gmra.mrb[20].mxu1 %vm645_vm2, %v1076_v47 }
 0x67f   : > { %1615 = vmatpush3.bf16.msra.mxu0 %v2528_v10  ;;  %1618 = vmatprep.mubr.msk.bf16.mxu0 %vm2101_vm0, %v2100_v0 }
 0x680   : > { %1616 = vmatprep.subr.bf16.mxu0 %v2100_v0 }
 0x683   : > { %1617 = vmatpush3.bf16.msra.mxu0 %v2536_v11 }
 0x686   : > { %1619 = vmatmul.mubr.msk.bf16.vlgmr.msra.gmra.mrb[24].mxu0 %vm645_vm2, %v1076_v47 }
 0x751   : > { %v1114_v44 = vpop.f32.mrb[20].mxu0  ;;  %v1154_v48 = vpop.f32.mrb[20].mxu1 }
 0x752   : > { %v1200_v49 = vadd.f32 %v1114_v44, %v2568_v38  ;;  %1208 = vrot.lane.b32.xlu1 %v1154_v48, %s2104_s19  ;;  %v1604_v50 = vpop.f32.mrb[21].mxu0  ;;  %v1612_v51 = vpop.f32.mrb[21].mxu1 }
 0x753   : > { %v1117_v53 = vpop.f32.mrb[22].mxu0  ;;  %v1157_v54 = vpop.f32.mrb[22].mxu1 }
 0x754   : > { %v1477_v10 = vmul.f32 -1.442695, %v1200_v49  ;;  %v1605_v55 = vpop.f32.mrb[23].mxu0  ;;  %v1613_v56 = vpop.f32.mrb[23].mxu1 }
 0x756   : > { %1800 = vpow2.f32 %v1477_v10 }
 0x759   : > { %v1194_v57 = vpop.f32.mrb[24].mxu0 }
 0x75a   : > { %v1620_v0 = vpop.f32.mrb[25].mxu0  ;;  %v1195_v61 = vadd.f32 %v2575_v52, %v1194_v57 }
 0x75b   : > { %v1197_v58 = vpop.f32.mrb[26].mxu0 }
 0x75c   : > { %v1621_v11 = vpop.f32.mrb[27].mxu0 }
 0x760   : > { %v1801_v59 = vpop.eup %1800 }
 0x761   : > { %v1204_v60 = vadd.f32 1.0, %v1801_v59 }
 0x763   : > { %1802 = vrcp.f32 %v1204_v60 }
 0x76d   : > { %v1803_v62 = vpop.eup %1802 }
 0x76e   : > { %v1218_v63 = vmul.f32 %v1803_v62, %v1195_v61 }
 0x770   : > { %1220 = vrot.lane.b32.xlu0 %v1218_v63, %s2103_s29  ;;  %s1297_s29 = sshll.u32 %s477_s4, 4  ;;  %s2652_s29 = int_to_ptr.vmem [resolvable:$true] %s1297_s29 }
 0x771   : > { %s1956_s9 = scalar_lea.vmem %s2652_s29, 128  ;;  %p1963_p10 = scmp.lt.s32.totalorder %s2652_s29, %s1961_s7 }
 0x772   : > { %p1957_p4 = scmp.ne.s32.totalorder %s2652_s29, %s1956_s9  ;;  %p1964_p6 = scmp.lt.s32.totalorder %s1962_s30, %s1956_s9 }
 0x774   : > { %p1958_p12 = pnand %p1957_p4, %p2353_p5  ;;  %p1965_p8 = por %p1964_p6, %p1963_p10 }
 0x776   : > { %p1959_p2 = pneg %p1958_p12 }
 0x778   : > { %p1966_p11 = pnand %p1965_p8, %p1959_p2 }
 0x7c4   : > { %v1209_v4 = vpop.permute.xlu1 %1208 }
 0x7c5   : > { %v1211_v5 = vadd.f32 %v1209_v4, %v2568_v38 }
 0x7c7   : > { %v1478_v9 = vmul.f32 -1.442695, %v1211_v5 }
 0x7e2   : > { %v1221_v1 = vpop.permute.xlu0 %1220 }
 0x7e3   : > { %v1223_v2 = vadd.f32 %v1221_v1, %v2568_v38  ;;  %v1479_v38 = vld [vmem:[%s2787_s24] ss:$0 sm:$0xff]  ;;  %s2792_s24 = smov %s2791_s20 }
 0x7e5   : > { %1804 = vtanh.f32 %v1223_v2 }
 0x7e6   : > { %1806 = vpow2.f32 %v1478_v9 }
 0x7ef   : > { %v1805_v3 = vpop.eup %1804 }
 0x7f0   : > { %1227 = vrot.lane.b32.xlu0 %v1805_v3, %s2105_s6  ;;  %v1807_v14 = vpop.eup %1806 }
 0x7f1   : > { %v1215_v6 = vadd.f32 1.0, %v1807_v14 }
 0x7f3   : > { %1808 = vrcp.f32 %v1215_v6 }
 0x7fd   : > { %v1809_v52 = vpop.eup %1808 }
 0x7fe   : > { %v1225_v15 = vsub.f32 1.0, %v1809_v52  ;;  %v1231_v17 = vmul.f32 %v1809_v52, %v1071_v45 }
 0x862   : > { %v1228_v16 = vpop.permute.xlu0 %1227 }
 0x863   : > { %v1230_v8 = vmul.f32 %v1228_v16, %v1225_v15 }
 0x865   : > { %v1232_v18 = vadd.f32 %v1231_v17, %v1230_v8 }
 0x867   : > { %v1233_v20 = vadd.f32 %v1232_v18, %v1072_v19 }
 0x869   : > { %1235 = vrot.lane.b32.xlu1 %v1233_v20, %s2105_s6 }
 0x8db   : > { %v1236_v21 = vpop.permute.xlu1 %1235 }
 0x8dc   : > { %v1238_v12 = vsel %vm645_vm2, %v1236_v21, 0.0 }
 0x8dd   : > { %1239 = vadd.xlane.f32.xlu0 %v1238_v12 }
 0x8f3   : > { %1262 = vrot.lane.b32.xlu0 %v1479_v38, %s2104_s19 }
 0x96a   : > { %v1240_v22 = vpop.xlane.xlu0 %1239 }
 0x96b   : > { %v1242_v23 = vmul.f32 0.03125, %v1240_v22 }
 0x96d   : > { %v1243_v24 = vsub.f32 %v1233_v20, %v1242_v23 }
 0x96e   : > { %v1263_v31 = vpop.permute.xlu0 %1262 }
 0x96f   : > { %v1244_v25 = vmul.f32 %v1243_v24, %v1243_v24 }
 0x971   : > { %1246 = vrot.lane.b32.xlu1 %v1244_v25, %s2105_s6 }
 0x9e3   : > { %v1247_v7 = vpop.permute.xlu1 %1246 }
 0x9e4   : > { %v1249_v26 = vsel %vm645_vm2, %v1247_v7, 0.0 }
 0x9e5   : > { %1250 = vadd.xlane.f32.xlu1 %v1249_v26 }
 0x9f6   : > { %1272 = vrot.lane.b32.xlu1 %v1480_v13, %s2104_s19 }
 0xa72   : > { %v1251_v27 = vpop.xlane.xlu1 %1250 }
 0xa73   : > { %v1252_v28 = vmul.f32 0.03125, %v1251_v27 }
 0xa75   : > { %v1253_v29 = vadd.f32 1e-05, %v1252_v28 }
 0xa76   : > { %v1273_v33 = vpop.permute.xlu1 %1272 }
 0xa77   : > { %1810 = vrsqrt.f32 %v1253_v29 }
 0xa81   : > { %v1811_v30 = vpop.eup %1810 }
 0xa82   : > { %v1255_v32 = vmul.f32 %v1811_v30, %v1243_v24 }
 0xa84   : > { %v1265_v34 = vmul.f32 %v1263_v31, %v1255_v32 }
 0xa86   : > { %v1275_v35 = vadd.f32 %v1273_v33, %v1265_v34 }
 0xa88   : > { %1277 = vrot.lane.b32.xlu0 %v1275_v35, %s2105_s6  ;;  %s1282_s6 = scalar_lea.sflag [#allocation4], %s2477_s0 }
 0xafa   : > { %v1278_v36 = vpop.permute.xlu0 %1277 }
 0xafb   : > { %1280 = vst.msk [vmem:[%s477_s4] sm:$0xff] %vm645_vm2, %v1278_v36 }
 0xafc   : > { %1969 = shalt.err (!%p1966_p11)
}
 0xafd   : > { %s1970_s0 = scalar_lea.hbm %s2650_s13, 128  ;;  %s1974_s27 = scalar_lea.hbm %s2792_s24, 512 }
 0xafe   : > { %p1971_p3 = scmp.ne.s32.totalorder %s2650_s13, %s1970_s0  ;;  %p1975_p7 = scmp.lt.u32.totalorder %s2650_s13, %s2792_s24 }
 0xaff   : > { %p1976_p9 = scmp.lt.u32.totalorder %s1974_s27, %s1970_s0  ;;  %p1978_p4 = scmp.lt.u32.totalorder %s1970_s0, %s2650_s13 }
 0xb00   : > { %p1972_p13 = pnand %p1971_p3, %p2353_p5 }
 0xb01   : > { %p1977_p1 = por %p1976_p9, %p1975_p7 }
 0xb02   : > { %p1973_p0 = pneg %p1972_p13 }
 0xb03   : > { %p1979_p12 = por %p1978_p4, %p1977_p1 }
 0xb05   : > { %p1980_p2 = pnand %p1979_p12, %p1973_p0 }
 0xb07   : > { %1983 = shalt.err (!%p1980_p2)
}
 0xb08   : > { %1640 = dma.vmem_to_hbm [thread:$0]  (%p2353_p5), %s2652_s29, 128, %s2650_s13, %s1282_s6  }
 0xb09 PF: > { %s2793_s19 = sld [smem:[#allocation17_spill]]  ;;  %s2794_s2 = sld [smem:[#allocation21_spill]] }
 0xb0a   : > { %p1670_p10 = scmp.ge.s32.totalorder %s2090_s23, 2 }
 0xb0f   : > { %s1309_s20 = sand.u32 1, %s2793_s19   ;;  %p2795_p6 = scmp.ne.s32.totalorder %s2794_s2, 0 }
 0xb10   : > { %s1310_s9 = scalar_lea.sflag [#allocation4], %s1309_s20 }
 0xb11   : > { %p1660_p8 = pnand %p1670_p10, %p2795_p6 }
 0xb13   : > { %2045 = dma.done.wait (!%p1660_p8), %s1310_s9, 128  }
 0xb14   : > { %2047 = vsyncadd (!%p1660_p8), %s1310_s9, 4294967168  ;;  %s30_s23 = sadd.s32 1, %s2090_s23   ;;  %s2796_s13 = smov %s2054_s14 }
 0xb15   : > { %p27_p11 = scmp.ge.s32.totalorder %s30_s23, 6   ;;  %s2797_s14 = smov %s2058_s15 }
 0xb16   : > { %s2798_s15 = smov %s2424_s11  ;;  %s2799_s16 = smov %s2066_s17 }
 0xb17   : > { %s2800_s17 = smov %s2070_s18  ;;  %s2801_s18 = smov %s2378_s25 }
 0xb18   : > { %s2802_s19 = smov %s2082_s21  ;;  %s2803_s20 = smov %s2086_s22 }
 0xb19   : > { %s2804_s21 = smov %s2807_s8  ;;  %s2805_s22 = smov %s2811_s12 }
 0xb1a   :  { %29 = sbr.rel (!%p27_p11) target bundleno = 23 (0x17), region = 130 }
 0xb21   :  { %1315 = vsyncpa [#allocation3], 1 }
 0xb22   :  { %1317 = vsyncpa [#allocation3 + $0x1], 1 }
 0xb23   :  { %1318 = vsyncpa [#allocation6], 1 }
 0xb24   :  { %1320 = vsyncpa [#allocation6 + $0x1], 1 }
 0xb25   :  { %1321 = vsyncpa [#allocation9], 1 }
 0xb26   :  { %1322 = vsyncpa [#allocation4], 1 }
 0xb27   :  { %1324 = vsyncpa [#allocation4 + $0x1], 1 }

</bundles_post_ra>
